<compile_context>
chip_gen: v7x
topology: tpu7x:2x2x1
jax: 0.10.0
libtpu: 0.0.40
codegen_flags: <defaults>
</compile_context>

<pallas_src>
import numpy as np
import jax
import jax.numpy as jnp
from jax.experimental import pallas as pl
from jax.experimental.pallas import tpu as pltpu


def _make_padder_kernel(H, W, padding_size):
    p_left, p_right, p_top, p_bot = padding_size
    H_out = H + p_top + p_bot
    W_out = W + p_left + p_right

    def kernel(x_ref, o_ref):
        nc = x_ref.shape[0]

        # SiLU in the native dtype (f32 here; bf16 stays native on v6e/v7x).
        # TODO(synk): on v5e with bf16 inputs, upcast to f32 (no bf16 VPU/EUP).
        x = x_ref[...]                                   # (nc, H, W)
        s = (x * jax.nn.sigmoid(x)).astype(o_ref.dtype)

        # ---- middle column band (real columns), split into 3 row bands ----
        o_ref[:, p_top:p_top + H, p_left:p_left + W] = s
        if p_top:
            o_ref[:, 0:p_top, p_left:p_left + W] = jnp.broadcast_to(
                s[:, 0:1, :], (nc, p_top, W))
        if p_bot:
            o_ref[:, p_top + H:H_out, p_left:p_left + W] = jnp.broadcast_to(
                s[:, H - 1:H, :], (nc, p_bot, W))

        # ---- left/right replicated columns (corners included), built from s
        # in registers: no store->load dependency on o_ref. ----
        if p_left or p_right:
            def full_height(col):                        # (nc, H, 1) -> (nc, H_out, 1)
                parts = []
                if p_top:
                    parts.append(jnp.broadcast_to(col[:, 0:1, :], (nc, p_top, 1)))
                parts.append(col)
                if p_bot:
                    parts.append(jnp.broadcast_to(col[:, H - 1:H, :], (nc, p_bot, 1)))
                return jnp.concatenate(parts, axis=1) if len(parts) > 1 else col

            if p_left:
                lcol = full_height(s[:, :, 0:1])
                o_ref[:, :, 0:p_left] = jnp.broadcast_to(
                    lcol, (nc, H_out, p_left))
            if p_right:
                rcol = full_height(s[:, :, W - 1:W])
                o_ref[:, :, p_left + W:W_out] = jnp.broadcast_to(
                    rcol, (nc, H_out, p_right))

    return kernel, H_out, W_out


def _pick_num_blocks(NC, plane_bytes):
    """Split the NC axis only when per-block work amortizes the ~0.35us grid-step
    overhead; target ~0.5-2 MiB blocks (v7x VMEM friendly, pipeline-overlappable),
    equal-sized (divisor of NC)."""
    SMALL_LIMIT = 256 * 1024        # below this: single block, no grid split
    TARGET_BLOCK = 2 * 1024 * 1024  # preferred per-block footprint
    total = NC * plane_bytes
    if NC < 2 or total <= SMALL_LIMIT:
        return 1
    want = min(NC, max(2, -(-total // TARGET_BLOCK)))   # ceil(total / target)
    best = 1
    for d in range(2, want + 1):
        if NC % d == 0:
            best = d
    if best == 1:
        best = 2 if NC % 2 == 0 else 1
    return best


def padder_forward(x, padding_size):
    """ReplicationPad2d(SiLU(x)); padding_size = (p_left, p_right, p_top, p_bottom)."""
    N, C, H, W = x.shape
    NC = N * C
    kernel, H_out, W_out = _make_padder_kernel(H, W, padding_size)

    x2 = x.reshape(NC, H, W)

    itemsize = jnp.dtype(x.dtype).itemsize
    plane_bytes = (H * W + H_out * W_out) * itemsize
    n_blocks = _pick_num_blocks(NC, plane_bytes)
    nc_blk = NC // n_blocks

    # Double-buffered in+out blocks plus headroom; capped at the v7x scoped
    # default so the same config is safe on every generation.
    block_bytes = nc_blk * plane_bytes
    vmem_limit = int(min(32 << 20, max(4 << 20, 4 * block_bytes)))

    cost = pl.CostEstimate(
        flops=4 * x.size,                    # mul + add per SiLU (approx)
        transcendentals=2 * x.size,          # exp + reciprocal per sigmoid
        bytes_accessed=(x.size + NC * H_out * W_out) * itemsize,
    )

    out2 = pl.pallas_call(
        kernel,
        out_shape=jax.ShapeDtypeStruct((NC, H_out, W_out), x.dtype),
        grid=(n_blocks,),
        in_specs=[pl.BlockSpec((nc_blk, H, W), lambda i: (i, 0, 0))],
        out_specs=pl.BlockSpec((nc_blk, H_out, W_out), lambda i: (i, 0, 0)),
        compiler_params=pltpu.CompilerParams(
            dimension_semantics=("parallel",),
            vmem_limit_bytes=vmem_limit,
        ),
        cost_estimate=cost,
    )(x2)

    return out2.reshape(N, C, H_out, W_out)


def padder_reference(x, padding_size):
    """Pure-JAX reference: SiLU then edge-replication pad (NCHW)."""
    p_left, p_right, p_top, p_bot = padding_size
    s = x * jax.nn.sigmoid(x)
    return jnp.pad(
        s,
        ((0, 0), (0, 0), (p_top, p_bot), (p_left, p_right)),
        mode="edge",
    )


if __name__ == "__main__":
    # Padder has no learned parameters; only the (static) padding tuple.
    padding_size = (2, 3, 1, 2)  # (p_left, p_right, p_upper, p_lower)

    key = jax.random.PRNGKey(0)
    x = jax.random.normal(key, (2, 4, 16, 16), dtype=jnp.float32)

    out = padder_forward(x, padding_size)
    out = jax.block_until_ready(out)

    ref = padder_reference(x, padding_size)
    np.testing.assert_allclose(np.asarray(out), np.asarray(ref),
                               rtol=1e-5, atol=1e-5)
    assert out.shape == (2, 4, 16 + 1 + 2, 16 + 2 + 3)

    print("KERNEL_OK")
</pallas_src>

<mosaic_0001>
module attributes {stable_mosaic.version = 11 : i64} {
  func.func @kernel(%arg0: i32, %arg1: memref<8x16x16xf32, #tpu.memory_space<vmem>>, %arg2: memref<8x19x21xf32, #tpu.memory_space<vmem>>) attributes {dimension_semantics = [#tpu.dimension_semantics<parallel>], iteration_bounds = array<i64: 1>, scalar_prefetch = 0 : i64, scratch_operands = 0 : i64, tpu.core_type = #tpu.core_type<tc>, window_params = [{transform_indices = @transform_0, window_bounds = array<i64: 8, 16, 16>}, {transform_indices = @transform_1, window_bounds = array<i64: 8, 19, 21>}]} {
    %c0 = arith.constant 0 : index
    %c0_0 = arith.constant 0 : index
    %c0_1 = arith.constant 0 : index
    %0 = vector.load %arg1[%c0, %c0_0, %c0_1] : memref<8x16x16xf32, #tpu.memory_space<vmem>>, vector<8x16x16xf32>
    %1 = arith.negf %0 : vector<8x16x16xf32>
    %2 = math.exp %1 : vector<8x16x16xf32>
    %cst = arith.constant 1.000000e+00 : f32
    %3 = vector.broadcast %cst : f32 to vector<8x16x16xf32>
    %4 = arith.addf %3, %2 : vector<8x16x16xf32>
    %5 = arith.divf %3, %4 : vector<8x16x16xf32>
    %6 = arith.mulf %0, %5 : vector<8x16x16xf32>
    %c0_2 = arith.constant 0 : index
    %c1 = arith.constant 1 : index
    %c2 = arith.constant 2 : index
    %7 = vector.load %arg2[%c0_2, %c1, %c2] : memref<8x19x21xf32, #tpu.memory_space<vmem>>, vector<8x16x16xf32>
    tpu.vector_store %arg2[%c0_2, %c1, %c2], %6 {strides = array<i32>} : memref<8x19x21xf32, #tpu.memory_space<vmem>>, vector<8x16x16xf32>,
    %8 = vector.extract_strided_slice %6 {offsets = [0, 0, 0], sizes = [8, 1, 16], strides = [1, 1, 1]} : vector<8x16x16xf32> to vector<8x1x16xf32>
    %c0_3 = arith.constant 0 : index
    %c0_4 = arith.constant 0 : index
    %c2_5 = arith.constant 2 : index
    %9 = vector.load %arg2[%c0_3, %c0_4, %c2_5] : memref<8x19x21xf32, #tpu.memory_space<vmem>>, vector<8x1x16xf32>
    tpu.vector_store %arg2[%c0_3, %c0_4, %c2_5], %8 {strides = array<i32>} : memref<8x19x21xf32, #tpu.memory_space<vmem>>, vector<8x1x16xf32>,
    %10 = vector.extract_strided_slice %6 {offsets = [0, 15, 0], sizes = [8, 1, 16], strides = [1, 1, 1]} : vector<8x16x16xf32> to vector<8x1x16xf32>
    %11 = vector.shape_cast %10 : vector<8x1x16xf32> to vector<8x1x16xf32>
    %12 = vector.broadcast %11 : vector<8x1x16xf32> to vector<8x2x16xf32>
    %c0_6 = arith.constant 0 : index
    %c17 = arith.constant 17 : index
    %c2_7 = arith.constant 2 : index
    %13 = vector.load %arg2[%c0_6, %c17, %c2_7] : memref<8x19x21xf32, #tpu.memory_space<vmem>>, vector<8x2x16xf32>
    tpu.vector_store %arg2[%c0_6, %c17, %c2_7], %12 {strides = array<i32>} : memref<8x19x21xf32, #tpu.memory_space<vmem>>, vector<8x2x16xf32>,
    %14 = vector.extract_strided_slice %6 {offsets = [0, 0, 0], sizes = [8, 16, 1], strides = [1, 1, 1]} : vector<8x16x16xf32> to vector<8x16x1xf32>
    %15 = vector.extract_strided_slice %14 {offsets = [0, 0, 0], sizes = [8, 1, 1], strides = [1, 1, 1]} : vector<8x16x1xf32> to vector<8x1x1xf32>
    %16 = vector.extract_strided_slice %14 {offsets = [0, 15, 0], sizes = [8, 1, 1], strides = [1, 1, 1]} : vector<8x16x1xf32> to vector<8x1x1xf32>
    %17 = vector.shape_cast %16 : vector<8x1x1xf32> to vector<8x1x1xf32>
    %18 = vector.broadcast %17 : vector<8x1x1xf32> to vector<8x2x1xf32>
    %19 = tpu.concatenate %15, %14, %18 in 1 : vector<8x1x1xf32>, vector<8x16x1xf32>, vector<8x2x1xf32> -> vector<8x19x1xf32>
    %20 = vector.shape_cast %19 : vector<8x19x1xf32> to vector<8x19x1xf32>
    %21 = vector.broadcast %20 : vector<8x19x1xf32> to vector<8x19x2xf32>
    %c0_8 = arith.constant 0 : index
    %c0_9 = arith.constant 0 : index
    %c0_10 = arith.constant 0 : index
    %22 = vector.load %arg2[%c0_8, %c0_9, %c0_10] : memref<8x19x21xf32, #tpu.memory_space<vmem>>, vector<8x19x2xf32>
    tpu.vector_store %arg2[%c0_8, %c0_9, %c0_10], %21 {strides = array<i32>} : memref<8x19x21xf32, #tpu.memory_space<vmem>>, vector<8x19x2xf32>,
    %23 = vector.extract_strided_slice %6 {offsets = [0, 0, 15], sizes = [8, 16, 1], strides = [1, 1, 1]} : vector<8x16x16xf32> to vector<8x16x1xf32>
    %24 = vector.extract_strided_slice %23 {offsets = [0, 0, 0], sizes = [8, 1, 1], strides = [1, 1, 1]} : vector<8x16x1xf32> to vector<8x1x1xf32>
    %25 = vector.extract_strided_slice %23 {offsets = [0, 15, 0], sizes = [8, 1, 1], strides = [1, 1, 1]} : vector<8x16x1xf32> to vector<8x1x1xf32>
    %26 = vector.shape_cast %25 : vector<8x1x1xf32> to vector<8x1x1xf32>
    %27 = vector.broadcast %26 : vector<8x1x1xf32> to vector<8x2x1xf32>
    %28 = tpu.concatenate %24, %23, %27 in 1 : vector<8x1x1xf32>, vector<8x16x1xf32>, vector<8x2x1xf32> -> vector<8x19x1xf32>
    %29 = vector.shape_cast %28 : vector<8x19x1xf32> to vector<8x19x1xf32>
    %30 = vector.broadcast %29 : vector<8x19x1xf32> to vector<8x19x3xf32>
    %c0_11 = arith.constant 0 : index
    %c0_12 = arith.constant 0 : index
    %c18 = arith.constant 18 : index
    %31 = vector.load %arg2[%c0_11, %c0_12, %c18] : memref<8x19x21xf32, #tpu.memory_space<vmem>>, vector<8x19x3xf32>
    tpu.vector_store %arg2[%c0_11, %c0_12, %c18], %30 {strides = array<i32>} : memref<8x19x21xf32, #tpu.memory_space<vmem>>, vector<8x19x3xf32>,
    return
  }
  func.func @transform_0(%arg0: i32) -> (i32, i32, i32) {
    %c0_i32 = arith.constant 0 : i32
    %c0_i32_0 = arith.constant 0 : i32
    %c0_i32_1 = arith.constant 0 : i32
    return %arg0, %c0_i32, %c0_i32_0 : i32, i32, i32
  }
  func.func @transform_1(%arg0: i32) -> (i32, i32, i32) {
    %c0_i32 = arith.constant 0 : i32
    %c0_i32_0 = arith.constant 0 : i32
    %c0_i32_1 = arith.constant 0 : i32
    return %arg0, %c0_i32, %c0_i32_0 : i32, i32, i32
  }
}

</mosaic_0001>

<bundles_post_ra>
// kernel: tpu_custom_call.1
= control target key start
LH: loop header
LB: loop body
LE: loop exit
PB: predicated region body
PF: predicated region fallthrough
CT: control target
= control target key end

     0   :  { %6 = vsyncpa [#allocation3], 0  ;;  %s749_s6 = smov [#allocation2]   ;;  %s1321_s0 = inlined_call_operand.hbm [shape: f32[8,16,16], index: 0, kind: input, shape index: {}]   ;;  %s1322_s1 = inlined_call_operand.vmem [shape: f32[8,19,21], index: 1, kind: output, shape index: {}]  }
   0x1   :  { %s12_s7 = sshll.u32 %s749_s6, 4  ;;  %s725_s10 = scalar_lea.hbm %s1321_s0, 2048  ;;  %s13_s7 = int_to_ptr.vmem [resolvable:$true] %s12_s7 }
   0x2   :  { %p726_p0 = scmp.ne.s32.totalorder %s1321_s0, %s725_s10  ;;  %p729_p1 = scmp.lt.u32.totalorder %s725_s10, %s1321_s0 }
   0x4   :  { %p731_p2 = pnand %p729_p1, %p726_p0 }
   0x6   :  { %734 = shalt.err (!%p731_p2)
}
   0x7   :  { %s735_s15 = scalar_lea.vmem %s13_s7, 2048  ;;  %p740_p4 = scmp.lt.s32.totalorder %s13_s7, %s13_s7 }
   0x8   :  { %p736_p3 = scmp.ne.s32.totalorder %s13_s7, %s735_s15  ;;  %p741_p5 = scmp.lt.s32.totalorder %s735_s15, %s735_s15 }
   0xa   :  { %p742_p6 = por %p741_p5, %p740_p4 }
   0xc   :  { %p743_p7 = pnand %p742_p6, %p736_p3 }
   0xe   :  { %746 = shalt.err (!%p743_p7)
}
   0xf   :  { %s750_s16 = smov 128   ;;  %s751_s17 = smov 8  }
  0x10   :  { %18 = dma.hbm_to_vmem [thread:$0]  %s1321_s0, 2048, %s13_s7, [#allocation3], %s750_s16, %s750_s16, %s751_s17  }
  0x11   :  { %747 = dma.done.wait [#allocation3], 2048  }
  0x12   :  { %748 = vsyncadd [#allocation3], 4294965248  ;;  %v752_v0 = vmov 0   ;;  %v777_v1 = vld [vmem:[#allocation2 + $0x10] sm:$0xff]  ;;  %v779_v2 = vld [vmem:[#allocation2] sm:$0xff]  ;;  %s753_s0 = smov 2  }
  0x13   :  { %658 = vset.pattern.permute.xlu1 %v752_v0  ;;  %657 = vset.pattern.permute.xlu0 %v752_v0  ;;  %v781_v3 = vld [vmem:[#allocation2 + $0x18] sm:$0xff]  ;;  %v637_v4 = vmul.f32 -1.442695, %v777_v1  ;;  %v635_v5 = vmul.f32 -1.442695, %v779_v2  ;;  %v786_v7 = vld [vmem:[#allocation2 + $0x8] sm:$0xff] }
  0x14   :  { %v638_v6 = vmul.f32 -1.442695, %v781_v3  ;;  %v788_v8 = vld [vmem:[#allocation2 + $0x28] sm:$0xff]  ;;  %v790_v9 = vld [vmem:[#allocation2 + $0x20] sm:$0xff]  ;;  %v636_v10 = vmul.f32 -1.442695, %v786_v7 }
  0x15   :  { %661 = vpow2.f32 %v637_v4  ;;  %v640_v11 = vmul.f32 -1.442695, %v788_v8  ;;  %v639_v12 = vmul.f32 -1.442695, %v790_v9  ;;  %v795_v13 = vld [vmem:[#allocation2 + $0x38] sm:$0xff]  ;;  %v797_v14 = vld [vmem:[#allocation2 + $0x30] sm:$0xff] }
  0x16   :  { %663 = vpow2.f32 %v635_v5  ;;  %v799_v15 = vld [vmem:[#allocation2 + $0x48] sm:$0xff]  ;;  %v642_v16 = vmul.f32 -1.442695, %v795_v13  ;;  %v641_v17 = vmul.f32 -1.442695, %v797_v14  ;;  %v803_v18 = vld [vmem:[#allocation2 + $0x40] sm:$0xff] }
  0x17   :  { %665 = vpow2.f32 %v638_v6  ;;  %v805_v19 = vld [vmem:[#allocation2 + $0x58] sm:$0xff]  ;;  %v644_v20 = vmul.f32 -1.442695, %v799_v15  ;;  %v808_v21 = vld [vmem:[#allocation2 + $0x50] sm:$0xff]  ;;  %v643_v22 = vmul.f32 -1.442695, %v803_v18 }
  0x18   :  { %667 = vpow2.f32 %v636_v10  ;;  %v811_v23 = vld [vmem:[#allocation2 + $0x68] sm:$0xff]  ;;  %v646_v24 = vmul.f32 -1.442695, %v805_v19  ;;  %v645_v25 = vmul.f32 -1.442695, %v808_v21  ;;  %v816_v45 = vld [vmem:[#allocation2 + $0x60] sm:$0xff] }
  0x19   :  { %669 = vpow2.f32 %v640_v11  ;;  %v648_v26 = vmul.f32 -1.442695, %v811_v23  ;;  %v818_v48 = vld [vmem:[#allocation2 + $0x78] sm:$0xff]  ;;  %v820_v51 = vld [vmem:[#allocation2 + $0x70] sm:$0xff]  ;;  %v647_v53 = vmul.f32 -1.442695, %v816_v45 }
  0x1a   :  { %671 = vpow2.f32 %v639_v12  ;;  %v650_v55 = vmul.f32 -1.442695, %v818_v48  ;;  %v649_v58 = vmul.f32 -1.442695, %v820_v51  ;;  %vm313_vm0 = vcmask 1040384  }
  0x1b   :  { %673 = vpow2.f32 %v642_v16  ;;  %vm214_vm1 = vcmask 146448   ;;  %vm231_vm2 = vcmask 139280   ;;  %vm304_vm3 = vcmask 140304  }
  0x1c   :  { %675 = vpow2.f32 %v641_v17  ;;  %vm482_vm4 = vcmask 15360   ;;  %vm485_vm5 = vcmask 10240   ;;  %vm604_vm6 = vcmask 171152  }
  0x1d   :  { %677 = vpow2.f32 %v644_v20  ;;  %vm607_vm7 = vcmask 166032  }
  0x1e   :  { %679 = vpow2.f32 %v643_v22 }
  0x1f   :  { %v662_v27 = vpop.eup %661  ;;  %681 = vpow2.f32 %v646_v24 }
  0x20   :  { %v664_v28 = vpop.eup %663  ;;  %v88_v29 = vadd.f32 1.0, %v662_v27  ;;  %683 = vpow2.f32 %v645_v25 }
  0x21   :  { %v666_v30 = vpop.eup %665  ;;  %v86_v31 = vadd.f32 1.0, %v664_v28  ;;  %685 = vpow2.f32 %v648_v26 }
  0x22   :  { %v668_v32 = vpop.eup %667  ;;  %687 = vrcp.f32 %v88_v29  ;;  %v89_v33 = vadd.f32 1.0, %v666_v30 }
  0x23   :  { %v670_v34 = vpop.eup %669  ;;  %689 = vrcp.f32 %v86_v31  ;;  %v87_v35 = vadd.f32 1.0, %v668_v32 }
  0x24   :  { %v672_v36 = vpop.eup %671  ;;  %691 = vrcp.f32 %v89_v33  ;;  %v91_v37 = vadd.f32 1.0, %v670_v34 }
  0x25   :  { %v674_v38 = vpop.eup %673  ;;  %693 = vrcp.f32 %v87_v35  ;;  %v90_v39 = vadd.f32 1.0, %v672_v36 }
  0x26   :  { %v676_v40 = vpop.eup %675  ;;  %695 = vrcp.f32 %v91_v37  ;;  %v93_v41 = vadd.f32 1.0, %v674_v38 }
  0x27   :  { %v678_v42 = vpop.eup %677  ;;  %697 = vrcp.f32 %v90_v39  ;;  %v92_v43 = vadd.f32 1.0, %v676_v40 }
  0x28   :  { %v680_v44 = vpop.eup %679  ;;  %v95_v47 = vadd.f32 1.0, %v678_v42  ;;  %699 = vrcp.f32 %v93_v41 }
  0x29   :  { %v682_v46 = vpop.eup %681  ;;  %v94_v50 = vadd.f32 1.0, %v680_v44  ;;  %701 = vrcp.f32 %v92_v43 }
  0x2a   :  { %v684_v49 = vpop.eup %683  ;;  %703 = vrcp.f32 %v95_v47  ;;  %v97_v61 = vadd.f32 1.0, %v682_v46 }
  0x2b   :  { %v686_v52 = vpop.eup %685  ;;  %705 = vrcp.f32 %v94_v50  ;;  %v96_v0 = vadd.f32 1.0, %v684_v49 }
  0x2c   :  { %v688_v54 = vpop.eup %687  ;;  %707 = vpow2.f32 %v647_v53  ;;  %v99_v5 = vadd.f32 1.0, %v686_v52 }
  0x2d   :  { %v690_v56 = vpop.eup %689  ;;  %v825_v57 = vmul.f32 %v688_v54, %v777_v1  ;;  %709 = vpow2.f32 %v650_v55 }
  0x2e   :  { %v692_v59 = vpop.eup %691  ;;  %v829_v60 = vmul.f32 %v690_v56, %v779_v2  ;;  %711 = vpow2.f32 %v649_v58 }
  0x2f   :  { %v694_v62 = vpop.eup %693  ;;  %170 = vrot.lane.b32.xlu1 %v825_v57, %s753_s0  ;;  %v834_v63 = vmul.f32 %v692_v59, %v781_v3  ;;  %713 = vrcp.f32 %v97_v61 }
  0x30   :  { %v696_v1 = vpop.eup %695  ;;  %166 = vrot.lane.b32.xlu0 %v829_v60, %s753_s0  ;;  %v839_v4 = vmul.f32 %v694_v62, %v786_v7  ;;  %715 = vrcp.f32 %v96_v0  ;;  %v314_v43 = vrot.slane %v829_v60, 7 }
  0x31   :  { %v698_v2 = vpop.eup %697  ;;  %v844_v3 = vmul.f32 %v696_v1, %v788_v8  ;;  %717 = vrcp.f32 %v99_v5  ;;  %v318_v50 = vrot.slane %v834_v63, 7 }
  0x32   :  { %v700_v6 = vpop.eup %699  ;;  %v849_v10 = vmul.f32 %v698_v2, %v790_v9  ;;  %v315_v44 = vrot.slane %v839_v4, 7  ;;  %v354_v47 = vsel %vm313_vm0, %v829_v60, %v314_v43 }
  0x33   :  { %172 = vrot.lane.b32.xlu1 %v834_v63, %s753_s0  ;;  %v702_v7 = vpop.eup %701  ;;  %v854_v12 = vmul.f32 %v700_v6, %v795_v13  ;;  %v321_v55 = vrot.slane %v844_v3, 7 }
  0x34   :  { %168 = vrot.lane.b32.xlu0 %v839_v4, %s753_s0  ;;  %v704_v11 = vpop.eup %703  ;;  %v859_v8 = vmul.f32 %v702_v7, %v797_v14  ;;  %v926_v46 = vsel %vm313_vm0, %v314_v43, %v315_v44  ;;  %v320_v53 = vrot.slane %v849_v10, 7 }
  0x35   :  { %v706_v16 = vpop.eup %705  ;;  %v864_v24 = vmul.f32 %v704_v11, %v799_v15  ;;  %v240_v15 = vlaneseq  ;;  %v324_v60 = vrot.slane %v854_v12, 7 }
  0x36   :  { %v708_v17 = vpop.eup %707  ;;  %v869_v26 = vmul.f32 %v706_v16, %v803_v18  ;;  %v356_v56 = vsel %vm313_vm0, %v849_v10, %v320_v53  ;;  %v322_v58 = vsel %vm313_vm0, %v320_v53, %v321_v55  ;;  %v323_v59 = vrot.slane %v859_v8, 7 }
  0x37   :  { %176 = vrot.lane.b32.xlu1 %v844_v3, %s753_s0  ;;  %v710_v20 = vpop.eup %709  ;;  %v98_v9 = vadd.f32 1.0, %v708_v17  ;;  %v241_v31 = vshrl.u32 %v240_v15, 7  ;;  %v327_v1 = vrot.slane %v864_v24, 7 }
  0x38   :  { %174 = vrot.lane.b32.xlu0 %v849_v10, %s753_s0  ;;  %v712_v22 = vpop.eup %711  ;;  %v101_v25 = vadd.f32 1.0, %v710_v20  ;;  %v357_v61 = vsel %vm313_vm0, %v859_v8, %v323_v59  ;;  %v325_v62 = vsel %vm313_vm0, %v323_v59, %v324_v60 }
  0x39   :  { %v714_v13 = vpop.eup %713  ;;  %719 = vrcp.f32 %v98_v9  ;;  %v100_v14 = vadd.f32 1.0, %v712_v22 }
  0x3a   :  { %v716_v27 = vpop.eup %715  ;;  %721 = vrcp.f32 %v101_v25  ;;  %v874_v28 = vmul.f32 %v714_v13, %v805_v19 }
  0x3b   :  { %180 = vrot.lane.b32.xlu1 %v854_v12, %s753_s0  ;;  %723 = vrcp.f32 %v100_v14  ;;  %v718_v29 = vpop.eup %717  ;;  %v879_v30 = vmul.f32 %v716_v27, %v808_v21  ;;  %v242_v21 = vsub.s32 7, %v241_v31 }
  0x3c   :  { %178 = vrot.lane.b32.xlu0 %v859_v8, %s753_s0  ;;  %v884_v18 = vmul.f32 %v718_v29, %v811_v23  ;;  %v330_v6 = vrot.slane %v874_v28, 7 }
  0x3d   :  { %v247_v36 = vrot.slane %v834_v63, %v242_v21  ;;  %v243_v37 = vrot.slane %v839_v4, %v242_v21  ;;  %v255_v38 = vrot.slane %v854_v12, %v242_v21  ;;  %v251_v39 = vrot.slane %v844_v3, %v242_v21 }
  0x3e   :  { %v263_v40 = vrot.slane %v874_v28, %v242_v21  ;;  %v259_v41 = vrot.slane %v864_v24, %v242_v21  ;;  %v326_v63 = vrot.slane %v869_v26, 7  ;;  %v329_v5 = vrot.slane %v879_v30, 7 }
  0x3f   :  { %184 = vrot.lane.b32.xlu1 %v864_v24, %s753_s0  ;;  %v362_v49 = vsel %vm313_vm0, %v315_v44, %v243_v37  ;;  %v363_v54 = vsel %vm313_vm0, %v318_v50, %v247_v36  ;;  %v365_v0 = vsel %vm313_vm0, %v324_v60, %v255_v38  ;;  %v333_v16 = vrot.slane %v884_v18, 7 }
  0x40   :  { %182 = vrot.lane.b32.xlu0 %v869_v26, %s753_s0  ;;  %v358_v4 = vsel %vm313_vm0, %v869_v26, %v326_v63  ;;  %v956_v2 = vsel %vm313_vm0, %v326_v63, %v327_v1  ;;  %v366_v3 = vsel %vm313_vm0, %v327_v1, %v259_v41  ;;  %v964_v10 = vsel %vm313_vm0, %v879_v30, %v329_v5 }
  0x41   :  { %v331_v7 = vsel %vm313_vm0, %v329_v5, %v330_v6  ;;  %v970_v12 = vsel %vm313_vm0, %v330_v6, %v263_v40  ;;  %v754_v26 = vmov 15  }
  0x43   :  { %188 = vrot.lane.b32.xlu1 %v874_v28, %s753_s0  ;;  %v720_v19 = vpop.eup %719 }
  0x44   :  { %186 = vrot.lane.b32.xlu0 %v879_v30, %s753_s0  ;;  %v722_v32 = vpop.eup %721  ;;  %v891_v33 = vmul.f32 %v720_v19, %v816_v45  ;;  %v267_v45 = vrot.slane %v884_v18, %v242_v21 }
  0x45   :  { %v724_v34 = vpop.eup %723  ;;  %v894_v35 = vmul.f32 %v722_v32, %v818_v48  ;;  %v317_v48 = vrot.slane %v825_v57, 7 }
  0x46   :  { %v899_v23 = vmul.f32 %v724_v34, %v820_v51  ;;  %v332_v11 = vrot.slane %v891_v33, 7  ;;  %v368_v9 = vsel %vm313_vm0, %v333_v16, %v267_v45 }
  0x47   :  { %192 = vrot.lane.b32.xlu1 %v884_v18, %s753_s0  ;;  %v917_v42 = vrot.slane %v894_v35, %v242_v21  ;;  %v355_v51 = vsel %vm313_vm0, %v825_v57, %v317_v48  ;;  %v319_v52 = vsel %vm313_vm0, %v317_v48, %v318_v50  ;;  %v364_v57 = vsel %vm313_vm0, %v321_v55, %v251_v39 }
  0x48   :  { %190 = vrot.lane.b32.xlu0 %v891_v33, %s753_s0  ;;  %v360_v8 = vsel %vm313_vm0, %v891_v33, %v332_v11  ;;  %v977_v17 = vsel %vm313_vm0, %v332_v11, %v333_v16  ;;  %v335_v20 = vrot.slane %v899_v23, 7  ;;  %v336_v22 = vrot.slane %v894_v35, 7 }
  0x4a   :  { %v985_v24 = vsel %vm313_vm0, %v899_v23, %v335_v20  ;;  %v337_v25 = vsel %vm313_vm0, %v335_v20, %v336_v22  ;;  %v991_v13 = vsel %vm313_vm0, %v336_v22, %v917_v42 }
  0x4b   :  { %196 = vrot.lane.b32.xlu1 %v894_v35, %s753_s0 }
  0x4c   :  { %194 = vrot.lane.b32.xlu0 %v899_v23, %s753_s0 }
  0x4f   :  { %282 = vrot.lane.b32.xlu1 %v247_v36, %s753_s0 }
  0x50   :  { %280 = vrot.lane.b32.xlu0 %v243_v37, %s753_s0 }
  0x53   :  { %286 = vrot.lane.b32.xlu1 %v255_v38, %s753_s0 }
  0x54   :  { %284 = vrot.lane.b32.xlu0 %v251_v39, %s753_s0 }
  0x57   :  { %290 = vrot.lane.b32.xlu1 %v263_v40, %s753_s0 }
  0x58   :  { %288 = vrot.lane.b32.xlu0 %v259_v41, %s753_s0 }
  0x5b   :  { %294 = vrot.lane.b32.xlu1 %v917_v42, %s753_s0 }
  0x5c   :  { %292 = vrot.lane.b32.xlu0 %v267_v45, %s753_s0 }
  0x5f   :  { %376 = vperm.xlu1 %658, %v926_v46  }
  0x60   :  { %372 = vperm.xlu0 %657, %v354_v47  }
  0x63   :  { %381 = vperm.xlu1 %658, %v362_v49  }
  0x64   :  { %386 = vperm.xlu0 %657, %v355_v51  }
  0x67   :  { %390 = vperm.xlu1 %658, %v319_v52  }
  0x68   :  { %395 = vperm.xlu0 %657, %v363_v54  }
  0x6b   :  { %400 = vperm.xlu1 %658, %v356_v56  }
  0x6c   :  { %404 = vperm.xlu0 %657, %v322_v58  }
  0x6f   :  { %409 = vperm.xlu1 %658, %v364_v57  }
  0x70   :  { %414 = vperm.xlu0 %657, %v357_v61  }
  0x73   :  { %418 = vperm.xlu1 %658, %v325_v62  }
  0x74   :  { %423 = vperm.xlu0 %657, %v365_v0  }
  0x77   :  { %428 = vperm.xlu1 %658, %v358_v4  }
  0x78   :  { %432 = vperm.xlu0 %657, %v956_v2  }
  0x7b   :  { %437 = vperm.xlu1 %658, %v366_v3  }
  0x7c   :  { %442 = vperm.xlu0 %657, %v964_v10  }
  0x7f   :  { %446 = vperm.xlu1 %658, %v331_v7  }
  0x80   :  { %451 = vperm.xlu0 %657, %v970_v12  }
  0x83   :  { %456 = vperm.xlu1 %658, %v360_v8  }
  0x84   :  { %460 = vperm.xlu0 %657, %v977_v17  }
  0x87   :  { %465 = vperm.xlu1 %658, %v368_v9  }
  0x88   :  { %470 = vperm.xlu0 %657, %v985_v24  }
  0x8b   :  { %474 = vperm.xlu1 %658, %v337_v25  }
  0x8c   :  { %479 = vperm.xlu0 %657, %v991_v13  }
  0x8f   :  { %659 = vset.pattern.permute.xlu1 %v754_v26 }
  0x90   :  { %509 = vperm.xlu1 %659, %v354_v47   ;;  %660 = vset.pattern.permute.xlu0 %v754_v26 }
  0x91   :  { %513 = vperm.xlu0 %660, %v926_v46  }
  0x94   :  { %517 = vperm.xlu1 %659, %v362_v49  }
  0x95   :  { %525 = vperm.xlu0 %660, %v319_v52  }
  0x98   :  { %521 = vperm.xlu1 %659, %v355_v51  }
  0x99   :  { %533 = vperm.xlu0 %660, %v356_v56  }
  0x9c   :  { %529 = vperm.xlu1 %659, %v363_v54  }
  0x9d   :  { %541 = vperm.xlu0 %660, %v364_v57  }
  0xa0   :  { %537 = vperm.xlu1 %659, %v322_v58  }
  0xa1   :  { %v171_v14 = vpop.permute.xlu1 %170  ;;  %549 = vperm.xlu0 %660, %v325_v62  }
  0xa2   :  { %217 = vst.msk [vmem:[%s1322_s1 + $0x19] sm:$0xff] %vm214_vm1, %v171_v14  ;;  %v167_v27 = vpop.permute.xlu0 %166 }
  0xa3   :  { %233 = vst.msk [vmem:[%s1322_s1 + $0x18] sm:$0x1] %vm231_vm2, %v171_v14  ;;  %232 = vst.msk [vmem:[%s1322_s1] sm:$0x1] %vm231_vm2, %v167_v27 }
  0xa4   :  { %215 = vst.msk [vmem:[%s1322_s1 + $0x1] sm:$0xff] %vm214_vm1, %v167_v27  ;;  %545 = vperm.xlu1 %659, %v357_v61  }
  0xa5   :  { %v173_v28 = vpop.permute.xlu1 %172  ;;  %557 = vperm.xlu0 %660, %v358_v4  }
  0xa6   :  { %218 = vst.msk [vmem:[%s1322_s1 + $0x21] sm:$0xff] %vm214_vm1, %v173_v28  ;;  %v169_v15 = vpop.permute.xlu0 %168 }
  0xa7   :  { %216 = vst.msk [vmem:[%s1322_s1 + $0x9] sm:$0xff] %vm214_vm1, %v169_v15 }
  0xa8   :  { %553 = vperm.xlu1 %659, %v365_v0  }
  0xa9   :  { %v177_v29 = vpop.permute.xlu1 %176  ;;  %565 = vperm.xlu0 %660, %v366_v3  }
  0xaa   :  { %220 = vst.msk [vmem:[%s1322_s1 + $0x39] sm:$0xff] %vm214_vm1, %v177_v29  ;;  %v175_v30 = vpop.permute.xlu0 %174 }
  0xab   :  { %219 = vst.msk [vmem:[%s1322_s1 + $0x31] sm:$0xff] %vm214_vm1, %v175_v30 }
  0xac   :  { %234 = vst.msk [vmem:[%s1322_s1 + $0x30] sm:$0x1] %vm231_vm2, %v175_v30  ;;  %561 = vperm.xlu1 %659, %v956_v2  }
  0xad   :  { %v181_v18 = vpop.permute.xlu1 %180  ;;  %573 = vperm.xlu0 %660, %v331_v7  }
  0xae   :  { %222 = vst.msk [vmem:[%s1322_s1 + $0x51] sm:$0xff] %vm214_vm1, %v181_v18  ;;  %v179_v31 = vpop.permute.xlu0 %178 }
  0xaf   :  { %221 = vst.msk [vmem:[%s1322_s1 + $0x49] sm:$0xff] %vm214_vm1, %v179_v31 }
  0xb0   :  { %235 = vst.msk [vmem:[%s1322_s1 + $0x48] sm:$0x1] %vm231_vm2, %v179_v31  ;;  %569 = vperm.xlu1 %659, %v964_v10  }
  0xb1   :  { %v185_v19 = vpop.permute.xlu1 %184  ;;  %581 = vperm.xlu0 %660, %v360_v8  }
  0xb2   :  { %224 = vst.msk [vmem:[%s1322_s1 + $0x69] sm:$0xff] %vm214_vm1, %v185_v19  ;;  %v183_v32 = vpop.permute.xlu0 %182 }
  0xb3   :  { %223 = vst.msk [vmem:[%s1322_s1 + $0x61] sm:$0xff] %vm214_vm1, %v183_v32 }
  0xb4   :  { %236 = vst.msk [vmem:[%s1322_s1 + $0x60] sm:$0x1] %vm231_vm2, %v183_v32  ;;  %577 = vperm.xlu1 %659, %v970_v12  }
  0xb5   :  { %v189_v33 = vpop.permute.xlu1 %188  ;;  %589 = vperm.xlu0 %660, %v368_v9  }
  0xb6   :  { %226 = vst.msk [vmem:[%s1322_s1 + $0x81] sm:$0xff] %vm214_vm1, %v189_v33  ;;  %v187_v21 = vpop.permute.xlu0 %186 }
  0xb7   :  { %225 = vst.msk [vmem:[%s1322_s1 + $0x79] sm:$0xff] %vm214_vm1, %v187_v21 }
  0xb8   :  { %237 = vst.msk [vmem:[%s1322_s1 + $0x78] sm:$0x1] %vm231_vm2, %v187_v21  ;;  %585 = vperm.xlu1 %659, %v977_v17  }
  0xb9   :  { %v193_v34 = vpop.permute.xlu1 %192  ;;  %597 = vperm.xlu0 %660, %v337_v25  }
  0xba   :  { %228 = vst.msk [vmem:[%s1322_s1 + $0x99] sm:$0xff] %vm214_vm1, %v193_v34  ;;  %v191_v35 = vpop.permute.xlu0 %190 }
  0xbb   :  { %227 = vst.msk [vmem:[%s1322_s1 + $0x91] sm:$0xff] %vm214_vm1, %v191_v35 }
  0xbc   :  { %593 = vperm.xlu1 %659, %v985_v24   ;;  %238 = vst.msk [vmem:[%s1322_s1 + $0x90] sm:$0x1] %vm231_vm2, %v191_v35 }
  0xbd   :  { %v197_v23 = vpop.permute.xlu1 %196 }
  0xbe   :  { %230 = vst.msk [vmem:[%s1322_s1 + $0xb1] sm:$0xff] %vm214_vm1, %v197_v23  ;;  %v195_v36 = vpop.permute.xlu0 %194 }
  0xbf   :  { %229 = vst.msk [vmem:[%s1322_s1 + $0xa9] sm:$0xff] %vm214_vm1, %v195_v36 }
  0xc0   :  { %601 = vperm.xlu1 %659, %v991_v13   ;;  %239 = vst.msk [vmem:[%s1322_s1 + $0xa8] sm:$0x1] %vm231_vm2, %v195_v36 }
  0xc1   :  { %v283_v37 = vpop.permute.xlu1 %282 }
  0xc2   :  { %306 = vst.msk [vmem:[%s1322_s1 + $0x29] sm:$0x3] %vm304_vm3, %v283_v37  ;;  %v281_v38 = vpop.permute.xlu0 %280 }
  0xc3   :  { %305 = vst.msk [vmem:[%s1322_s1 + $0x11] sm:$0x3] %vm304_vm3, %v281_v38 }
  0xc5   :  { %v287_v39 = vpop.permute.xlu1 %286 }
  0xc6   :  { %308 = vst.msk [vmem:[%s1322_s1 + $0x59] sm:$0x3] %vm304_vm3, %v287_v39  ;;  %v285_v40 = vpop.permute.xlu0 %284 }
  0xc7   :  { %307 = vst.msk [vmem:[%s1322_s1 + $0x41] sm:$0x3] %vm304_vm3, %v285_v40 }
  0xc9   :  { %v291_v41 = vpop.permute.xlu1 %290 }
  0xca   :  { %310 = vst.msk [vmem:[%s1322_s1 + $0x89] sm:$0x3] %vm304_vm3, %v291_v41  ;;  %v289_v42 = vpop.permute.xlu0 %288 }
  0xcb   :  { %309 = vst.msk [vmem:[%s1322_s1 + $0x71] sm:$0x3] %vm304_vm3, %v289_v42 }
  0xcd   :  { %v295_v43 = vpop.permute.xlu1 %294 }
  0xce   :  { %312 = vst.msk [vmem:[%s1322_s1 + $0xb9] sm:$0x3] %vm304_vm3, %v295_v43  ;;  %v293_v44 = vpop.permute.xlu0 %292 }
  0xcf   :  { %311 = vst.msk [vmem:[%s1322_s1 + $0xa1] sm:$0x3] %vm304_vm3, %v293_v44 }
  0xde   :  { %v377_v45 = vpop.permute.xlu1 %376 }
  0xdf   :  { %484 = vst.msk [vmem:[%s1322_s1 + $0x8] sm:$0xff] %vm482_vm4, %v377_v45  ;;  %v373_v46 = vpop.permute.xlu0 %372 }
  0xe0   :  { %483 = vst.msk [vmem:[%s1322_s1] sm:$0xff] %vm482_vm4, %v373_v46 }
  0xe2   :  { %v382_v47 = vpop.permute.xlu1 %381 }
  0xe3   :  { %486 = vst.msk [vmem:[%s1322_s1 + $0x10] sm:$0x7] %vm485_vm5, %v382_v47  ;;  %v387_v48 = vpop.permute.xlu0 %386 }
  0xe4   :  { %487 = vst.msk [vmem:[%s1322_s1 + $0x18] sm:$0xff] %vm482_vm4, %v387_v48 }
  0xe6   :  { %v391_v49 = vpop.permute.xlu1 %390 }
  0xe7   :  { %488 = vst.msk [vmem:[%s1322_s1 + $0x20] sm:$0xff] %vm482_vm4, %v391_v49  ;;  %v396_v50 = vpop.permute.xlu0 %395 }
  0xe8   :  { %489 = vst.msk [vmem:[%s1322_s1 + $0x28] sm:$0x7] %vm485_vm5, %v396_v50 }
  0xea   :  { %v401_v51 = vpop.permute.xlu1 %400 }
  0xeb   :  { %490 = vst.msk [vmem:[%s1322_s1 + $0x30] sm:$0xff] %vm482_vm4, %v401_v51  ;;  %v405_v52 = vpop.permute.xlu0 %404 }
  0xec   :  { %491 = vst.msk [vmem:[%s1322_s1 + $0x38] sm:$0xff] %vm482_vm4, %v405_v52 }
  0xee   :  { %v410_v53 = vpop.permute.xlu1 %409 }
  0xef   :  { %492 = vst.msk [vmem:[%s1322_s1 + $0x40] sm:$0x7] %vm485_vm5, %v410_v53  ;;  %v415_v54 = vpop.permute.xlu0 %414 }
  0xf0   :  { %493 = vst.msk [vmem:[%s1322_s1 + $0x48] sm:$0xff] %vm482_vm4, %v415_v54 }
  0xf2   :  { %v419_v55 = vpop.permute.xlu1 %418 }
  0xf3   :  { %494 = vst.msk [vmem:[%s1322_s1 + $0x50] sm:$0xff] %vm482_vm4, %v419_v55  ;;  %v424_v56 = vpop.permute.xlu0 %423 }
  0xf4   :  { %495 = vst.msk [vmem:[%s1322_s1 + $0x58] sm:$0x7] %vm485_vm5, %v424_v56 }
  0xf6   :  { %v429_v58 = vpop.permute.xlu1 %428 }
  0xf7   :  { %496 = vst.msk [vmem:[%s1322_s1 + $0x60] sm:$0xff] %vm482_vm4, %v429_v58  ;;  %v433_v59 = vpop.permute.xlu0 %432 }
  0xf8   :  { %497 = vst.msk [vmem:[%s1322_s1 + $0x68] sm:$0xff] %vm482_vm4, %v433_v59 }
  0xfa   :  { %v438_v57 = vpop.permute.xlu1 %437 }
  0xfb   :  { %498 = vst.msk [vmem:[%s1322_s1 + $0x70] sm:$0x7] %vm485_vm5, %v438_v57  ;;  %v443_v60 = vpop.permute.xlu0 %442 }
  0xfc   :  { %499 = vst.msk [vmem:[%s1322_s1 + $0x78] sm:$0xff] %vm482_vm4, %v443_v60 }
  0xfe   :  { %v447_v61 = vpop.permute.xlu1 %446 }
  0xff   :  { %500 = vst.msk [vmem:[%s1322_s1 + $0x80] sm:$0xff] %vm482_vm4, %v447_v61  ;;  %v452_v62 = vpop.permute.xlu0 %451 }
 0x100   :  { %501 = vst.msk [vmem:[%s1322_s1 + $0x88] sm:$0x7] %vm485_vm5, %v452_v62 }
 0x102   :  { %v457_v63 = vpop.permute.xlu1 %456 }
 0x103   :  { %502 = vst.msk [vmem:[%s1322_s1 + $0x90] sm:$0xff] %vm482_vm4, %v457_v63  ;;  %v461_v0 = vpop.permute.xlu0 %460 }
 0x104   :  { %503 = vst.msk [vmem:[%s1322_s1 + $0x98] sm:$0xff] %vm482_vm4, %v461_v0 }
 0x106   :  { %v466_v1 = vpop.permute.xlu1 %465 }
 0x107   :  { %504 = vst.msk [vmem:[%s1322_s1 + $0xa0] sm:$0x7] %vm485_vm5, %v466_v1  ;;  %v471_v4 = vpop.permute.xlu0 %470 }
 0x108   :  { %505 = vst.msk [vmem:[%s1322_s1 + $0xa8] sm:$0xff] %vm482_vm4, %v471_v4 }
 0x10a   :  { %v475_v2 = vpop.permute.xlu1 %474 }
 0x10b   :  { %506 = vst.msk [vmem:[%s1322_s1 + $0xb0] sm:$0xff] %vm482_vm4, %v475_v2  ;;  %v480_v5 = vpop.permute.xlu0 %479 }
 0x10c   :  { %507 = vst.msk [vmem:[%s1322_s1 + $0xb8] sm:$0x7] %vm485_vm5, %v480_v5 }
 0x10f   :  { %v510_v3 = vpop.permute.xlu1 %509 }
 0x110   :  { %605 = vst.msk [vmem:[%s1322_s1] sm:$0xff] %vm604_vm6, %v510_v3  ;;  %v514_v6 = vpop.permute.xlu0 %513 }
 0x111   :  { %606 = vst.msk [vmem:[%s1322_s1 + $0x8] sm:$0xff] %vm604_vm6, %v514_v6 }
 0x113   :  { %v518_v10 = vpop.permute.xlu1 %517 }
 0x114   :  { %608 = vst.msk [vmem:[%s1322_s1 + $0x10] sm:$0x7] %vm607_vm7, %v518_v10  ;;  %v526_v7 = vpop.permute.xlu0 %525 }
 0x115   :  { %610 = vst.msk [vmem:[%s1322_s1 + $0x20] sm:$0xff] %vm604_vm6, %v526_v7 }
 0x117   :  { %v522_v11 = vpop.permute.xlu1 %521 }
 0x118   :  { %609 = vst.msk [vmem:[%s1322_s1 + $0x18] sm:$0xff] %vm604_vm6, %v522_v11  ;;  %v534_v12 = vpop.permute.xlu0 %533 }
 0x119   :  { %612 = vst.msk [vmem:[%s1322_s1 + $0x30] sm:$0xff] %vm604_vm6, %v534_v12 }
 0x11b   :  { %v530_v16 = vpop.permute.xlu1 %529 }
 0x11c   :  { %611 = vst.msk [vmem:[%s1322_s1 + $0x28] sm:$0x7] %vm607_vm7, %v530_v16  ;;  %v542_v8 = vpop.permute.xlu0 %541 }
 0x11d   :  { %614 = vst.msk [vmem:[%s1322_s1 + $0x40] sm:$0x7] %vm607_vm7, %v542_v8 }
 0x11f   :  { %v538_v17 = vpop.permute.xlu1 %537 }
 0x120   :  { %613 = vst.msk [vmem:[%s1322_s1 + $0x38] sm:$0xff] %vm604_vm6, %v538_v17  ;;  %v550_v20 = vpop.permute.xlu0 %549 }
 0x121   :  { %616 = vst.msk [vmem:[%s1322_s1 + $0x50] sm:$0xff] %vm604_vm6, %v550_v20 }
 0x123   :  { %v546_v9 = vpop.permute.xlu1 %545 }
 0x124   :  { %615 = vst.msk [vmem:[%s1322_s1 + $0x48] sm:$0xff] %vm604_vm6, %v546_v9  ;;  %v558_v22 = vpop.permute.xlu0 %557 }
 0x125   :  { %618 = vst.msk [vmem:[%s1322_s1 + $0x60] sm:$0xff] %vm604_vm6, %v558_v22 }
 0x127   :  { %v554_v24 = vpop.permute.xlu1 %553 }
 0x128   :  { %617 = vst.msk [vmem:[%s1322_s1 + $0x58] sm:$0x7] %vm607_vm7, %v554_v24  ;;  %v566_v25 = vpop.permute.xlu0 %565 }
 0x129   :  { %620 = vst.msk [vmem:[%s1322_s1 + $0x70] sm:$0x7] %vm607_vm7, %v566_v25 }
 0x12b   :  { %v562_v13 = vpop.permute.xlu1 %561 }
 0x12c   :  { %619 = vst.msk [vmem:[%s1322_s1 + $0x68] sm:$0xff] %vm604_vm6, %v562_v13  ;;  %v574_v26 = vpop.permute.xlu0 %573 }
 0x12d   :  { %622 = vst.msk [vmem:[%s1322_s1 + $0x80] sm:$0xff] %vm604_vm6, %v574_v26 }
 0x12f   :  { %v570_v14 = vpop.permute.xlu1 %569 }
 0x130   :  { %621 = vst.msk [vmem:[%s1322_s1 + $0x78] sm:$0xff] %vm604_vm6, %v570_v14  ;;  %v582_v27 = vpop.permute.xlu0 %581 }
 0x131   :  { %624 = vst.msk [vmem:[%s1322_s1 + $0x90] sm:$0xff] %vm604_vm6, %v582_v27 }
 0x133   :  { %v578_v28 = vpop.permute.xlu1 %577 }
 0x134   :  { %623 = vst.msk [vmem:[%s1322_s1 + $0x88] sm:$0x7] %vm607_vm7, %v578_v28  ;;  %v590_v15 = vpop.permute.xlu0 %589 }
 0x135   :  { %626 = vst.msk [vmem:[%s1322_s1 + $0xa0] sm:$0x7] %vm607_vm7, %v590_v15 }
 0x137   :  { %v586_v29 = vpop.permute.xlu1 %585 }
 0x138   :  { %625 = vst.msk [vmem:[%s1322_s1 + $0x98] sm:$0xff] %vm604_vm6, %v586_v29  ;;  %v598_v30 = vpop.permute.xlu0 %597 }
 0x139   :  { %628 = vst.msk [vmem:[%s1322_s1 + $0xb0] sm:$0xff] %vm604_vm6, %v598_v30 }
 0x13b   :  { %v594_v18 = vpop.permute.xlu1 %593 }
 0x13c   :  { %627 = vst.msk [vmem:[%s1322_s1 + $0xa8] sm:$0xff] %vm604_vm6, %v594_v18 }
 0x13f   :  { %v602_v31 = vpop.permute.xlu1 %601 }
 0x140   :  { %629 = vst.msk [vmem:[%s1322_s1 + $0xb8] sm:$0x7] %vm607_vm7, %v602_v31 }
 0x141   :  { %634 = vsyncpa [#allocation3], 1 }

</bundles_post_ra>
